<compile_context>
chip_gen: v7x
topology: tpu7x:2x2x1
jax: 0.10.0
libtpu: 0.0.40
codegen_flags: <defaults>
</compile_context>

<pallas_src>
import jax
import jax.numpy as jnp
from jax.experimental import pallas as pl
from jax.experimental.pallas import tpu as pltpu


def concat_conv_kernel(x_ref, y_ref, wx_ref, wy_ref, b_ref, o_ref):
    # x_ref: (1, Cx, tS), y_ref: (1, Cy, tS)
    # wx_ref: (O, Cx), wy_ref: (O, Cy), b_ref: (O, 1), o_ref: (1, O, tS)
    Cx = x_ref.shape[1]
    Cy = y_ref.shape[1]
    x = x_ref[0]                                           # (Cx, tS)
    y = y_ref[0]                                           # (Cy, tS)
    wx = wx_ref[...].astype(jnp.float32)                   # (O, Cx)
    wy = wy_ref[...].astype(jnp.float32)                   # (O, Cy)

    # VPU broadcast-FMA: (O,1) lane-broadcast weight column times (1,tS)
    # sublane-broadcast channel row.  Static Python loop (Cx+Cy tiny).
    acc = wx[:, 0:1] * x[0:1, :].astype(jnp.float32)       # (O, tS) f32
    for c in range(1, Cx):
        acc = acc + wx[:, c:c + 1] * x[c:c + 1, :].astype(jnp.float32)
    for c in range(Cy):
        acc = acc + wy[:, c:c + 1] * y[c:c + 1, :].astype(jnp.float32)

    o_ref[0] = (acc + b_ref[...].astype(jnp.float32)).astype(o_ref.dtype)


def _tile_target_and_cores():
    """Generation-aware spatial-tile target (lanes) and TCs per chip."""
    try:
        kind = jax.devices()[0].device_kind.lower()
    except Exception:  # pragma: no cover - defensive
        kind = ""
    if "v7" in kind:
        return 131072, 2
    if "v6" in kind:
        return 65536, 1
    if "v5" in kind:
        return 32768, 1
    return 32768, 1


def concat_conv3d(x, y, weight, bias, *, tile_s=None, out_dtype=None):
    """x: (N, Cx, D, H, W), y: (N, Cy, D, H, W)
    weight: (O, Cx+Cy, 1, 1, 1)  (PyTorch Conv3d layout), bias: (O,)
    returns: (N, O, D, H, W)
    """
    N, Cx, D, H, W = x.shape
    Cy = y.shape[1]
    O = weight.shape[0]
    S = D * H * W
    out_dtype = x.dtype if out_dtype is None else out_dtype

    # Free reshapes (contiguous): NCDHW -> (N, C, S).
    x3 = x.reshape(N, Cx, S)
    y3 = y.reshape(N, Cy, S)

    # ---- Spatial tile selection (lane-dense, VMEM-budgeted) ----------------
    target, n_tc = _tile_target_and_cores()
    if tile_s is not None:
        target = tile_s
    target = max(128, (target // 128) * 128)

    itemsize = jnp.dtype(x.dtype).itemsize
    out_itemsize = jnp.dtype(out_dtype).itemsize
    sub = max(8, 32 // itemsize)              # sublane padding granularity
    sub_out = max(8, 32 // out_itemsize)
    pad_in = lambda c: -(-c // sub) * sub
    pad_out = lambda c: -(-c // sub_out) * sub_out

    def footprint(ts):
        # Double-buffered per-step VMEM bytes (blocks pad C/O to full sublanes).
        in_b = (pad_in(Cx) + pad_in(Cy)) * ts * itemsize
        out_b = pad_out(O) * ts * out_itemsize
        return 2 * (in_b + out_b)

    vmem_budget = 30 << 20                    # keep headroom vs v7x 64 MiB VMEM
    while target > 128 and footprint(target) > vmem_budget:
        target //= 2
    target = max(128, (target // 128) * 128)

    if S <= target:
        tS = S            # block == full dim: no divisibility/masking issues
    else:
        tS = target       # multiple of 128; trailing block may be partial

    # v7x: make sure there is at least one grid step per TensorCore.
    if n_tc > 1 and N * pl.cdiv(S, tS) < n_tc and S > 128:
        per_core = -(-S // n_tc)
        tS = max(128, (-(-per_core // 128)) * 128)

    vmem_limit = max(footprint(tS) + (4 << 20), 16 << 20)

    # ---- Fold the concat into split weights --------------------------------
    w2 = weight.reshape(O, Cx + Cy)
    wx = w2[:, :Cx]                                           # (O, Cx)
    wy = w2[:, Cx:]                                           # (O, Cy)
    b2 = bias.reshape(O, 1)                                   # (O, 1)

    grid = (N, pl.cdiv(S, tS))

    out3 = pl.pallas_call(
        concat_conv_kernel,
        out_shape=jax.ShapeDtypeStruct((N, O, S), out_dtype),
        grid_spec=pltpu.PrefetchScalarGridSpec(
            num_scalar_prefetch=0,
            grid=grid,
            in_specs=[
                pl.BlockSpec((1, Cx, tS), lambda n, s: (n, 0, s)),
                pl.BlockSpec((1, Cy, tS), lambda n, s: (n, 0, s)),
                pl.BlockSpec((O, Cx), lambda n, s: (0, 0)),
                pl.BlockSpec((O, Cy), lambda n, s: (0, 0)),
                pl.BlockSpec((O, 1), lambda n, s: (0, 0)),
            ],
            out_specs=pl.BlockSpec((1, O, tS), lambda n, s: (n, 0, s)),
        ),
        compiler_params=pltpu.CompilerParams(
            dimension_semantics=("parallel", "parallel"),
            vmem_limit_bytes=int(vmem_limit)),
    )(x3, y3, wx, wy, b2)

    return out3.reshape(N, O, D, H, W)


if __name__ == "__main__":
    # Small shapes: batch=2, x has 3 channels, y has 1 channel (conv
    # in_channels = 4 after concat), out_channels=8, spatial 4x4x4.
    N, Cx, Cy, O = 2, 3, 1, 8
    D = H = W = 4

    key = jax.random.PRNGKey(0)
    kx, ky, kw, kb = jax.random.split(key, 4)
    x = jax.random.normal(kx, (N, Cx, D, H, W), dtype=jnp.float32)
    y = jax.random.normal(ky, (N, Cy, D, H, W), dtype=jnp.float32)
    # Deterministic synthetic Conv3d parameters (kernel_size=1).
    weight = jax.random.normal(kw, (O, Cx + Cy, 1, 1, 1), dtype=jnp.float32) * 0.1
    bias = jax.random.normal(kb, (O,), dtype=jnp.float32) * 0.1

    out = concat_conv3d(x, y, weight, bias)
    out = jax.block_until_ready(out)

    # Reference check in plain JAX (same math as torch.cat + 1x1x1 Conv3d).
    xy = jnp.concatenate([x, y], axis=1)                      # (N, C, D, H, W)
    ref = jnp.einsum("ncdhw,oc->nodhw", xy, weight.reshape(O, Cx + Cy),
                     precision=jax.lax.Precision.HIGHEST)
    ref = ref + bias.reshape(1, O, 1, 1, 1)
    assert out.shape == (N, O, D, H, W)
    assert jnp.allclose(out, ref, atol=1e-5, rtol=1e-5)

    print("KERNEL_OK")
</pallas_src>

<mosaic_0001>
module attributes {stable_mosaic.version = 11 : i64} {
  func.func @concat_conv_kernel(%arg0: i32, %arg1: i32, %arg2: memref<1x3x64xf32, #tpu.memory_space<vmem>>, %arg3: memref<1x1x64xf32, #tpu.memory_space<vmem>>, %arg4: memref<8x3xf32, #tpu.memory_space<vmem>>, %arg5: memref<8x1xf32, #tpu.memory_space<vmem>>, %arg6: memref<8x1xf32, #tpu.memory_space<vmem>>, %arg7: memref<1x8x64xf32, #tpu.memory_space<vmem>>) attributes {dimension_semantics = [#tpu.dimension_semantics<parallel>, #tpu.dimension_semantics<parallel>], iteration_bounds = array<i64: 2, 1>, scalar_prefetch = 0 : i64, scratch_operands = 0 : i64, tpu.core_type = #tpu.core_type<tc>, window_params = [{transform_indices = @transform_0, window_bounds = array<i64: 1, 3, 64>}, {transform_indices = @transform_1, window_bounds = array<i64: 1, 1, 64>}, {pipeline_mode = #tpu.pipeline_mode<synchronous>, transform_indices = @transform_2, window_bounds = array<i64: 8, 3>}, {pipeline_mode = #tpu.pipeline_mode<synchronous>, transform_indices = @transform_3, window_bounds = array<i64: 8, 1>}, {pipeline_mode = #tpu.pipeline_mode<synchronous>, transform_indices = @transform_4, window_bounds = array<i64: 8, 1>}, {transform_indices = @transform_5, window_bounds = array<i64: 1, 8, 64>}]} {
    %c0 = arith.constant 0 : index
    %c0_0 = arith.constant 0 : index
    %c0_1 = arith.constant 0 : index
    %0 = vector.load %arg2[%c0, %c0_0, %c0_1] : memref<1x3x64xf32, #tpu.memory_space<vmem>>, vector<1x3x64xf32>
    %1 = vector.shape_cast %0 : vector<1x3x64xf32> to vector<3x64xf32>
    %c0_2 = arith.constant 0 : index
    %c0_3 = arith.constant 0 : index
    %c0_4 = arith.constant 0 : index
    %2 = vector.load %arg3[%c0_2, %c0_3, %c0_4] : memref<1x1x64xf32, #tpu.memory_space<vmem>>, vector<1x1x64xf32>
    %3 = vector.shape_cast %2 : vector<1x1x64xf32> to vector<1x64xf32>
    %c0_5 = arith.constant 0 : index
    %c0_6 = arith.constant 0 : index
    %4 = vector.load %arg4[%c0_5, %c0_6] : memref<8x3xf32, #tpu.memory_space<vmem>>, vector<8x3xf32>
    %c0_7 = arith.constant 0 : index
    %c0_8 = arith.constant 0 : index
    %5 = vector.load %arg5[%c0_7, %c0_8] : memref<8x1xf32, #tpu.memory_space<vmem>>, vector<8x1xf32>
    %6 = vector.extract_strided_slice %4 {offsets = [0, 0], sizes = [8, 1], strides = [1, 1]} : vector<8x3xf32> to vector<8x1xf32>
    %7 = vector.extract_strided_slice %1 {offsets = [0, 0], sizes = [1, 64], strides = [1, 1]} : vector<3x64xf32> to vector<1x64xf32>
    %8 = vector.broadcast %6 : vector<8x1xf32> to vector<8x64xf32>
    %9 = vector.broadcast %7 : vector<1x64xf32> to vector<8x64xf32>
    %10 = arith.mulf %8, %9 : vector<8x64xf32>
    %11 = vector.extract_strided_slice %4 {offsets = [0, 1], sizes = [8, 1], strides = [1, 1]} : vector<8x3xf32> to vector<8x1xf32>
    %12 = vector.extract_strided_slice %1 {offsets = [1, 0], sizes = [1, 64], strides = [1, 1]} : vector<3x64xf32> to vector<1x64xf32>
    %13 = vector.broadcast %11 : vector<8x1xf32> to vector<8x64xf32>
    %14 = vector.broadcast %12 : vector<1x64xf32> to vector<8x64xf32>
    %15 = arith.mulf %13, %14 : vector<8x64xf32>
    %16 = arith.addf %10, %15 : vector<8x64xf32>
    %17 = vector.extract_strided_slice %4 {offsets = [0, 2], sizes = [8, 1], strides = [1, 1]} : vector<8x3xf32> to vector<8x1xf32>
    %18 = vector.extract_strided_slice %1 {offsets = [2, 0], sizes = [1, 64], strides = [1, 1]} : vector<3x64xf32> to vector<1x64xf32>
    %19 = vector.broadcast %17 : vector<8x1xf32> to vector<8x64xf32>
    %20 = vector.broadcast %18 : vector<1x64xf32> to vector<8x64xf32>
    %21 = arith.mulf %19, %20 : vector<8x64xf32>
    %22 = arith.addf %16, %21 : vector<8x64xf32>
    %23 = vector.broadcast %5 : vector<8x1xf32> to vector<8x64xf32>
    %24 = vector.broadcast %3 : vector<1x64xf32> to vector<8x64xf32>
    %25 = arith.mulf %23, %24 : vector<8x64xf32>
    %26 = arith.addf %22, %25 : vector<8x64xf32>
    %c0_9 = arith.constant 0 : index
    %c0_10 = arith.constant 0 : index
    %27 = vector.load %arg6[%c0_9, %c0_10] : memref<8x1xf32, #tpu.memory_space<vmem>>, vector<8x1xf32>
    %28 = vector.broadcast %27 : vector<8x1xf32> to vector<8x64xf32>
    %29 = arith.addf %26, %28 : vector<8x64xf32>
    %c0_11 = arith.constant 0 : index
    %c0_12 = arith.constant 0 : index
    %c0_13 = arith.constant 0 : index
    %30 = vector.load %arg7[%c0_11, %c0_12, %c0_13] : memref<1x8x64xf32, #tpu.memory_space<vmem>>, vector<1x8x64xf32>
    %31 = vector.shape_cast %30 : vector<1x8x64xf32> to vector<8x64xf32>
    %32 = vector.shape_cast %29 : vector<8x64xf32> to vector<1x8x64xf32>
    tpu.vector_store %arg7[%c0_11, %c0_12, %c0_13], %32 {strides = array<i32>} : memref<1x8x64xf32, #tpu.memory_space<vmem>>, vector<1x8x64xf32>,
    return
  }
  func.func @transform_0(%arg0: i32, %arg1: i32) -> (i32, i32, i32) {
    %c0_i32 = arith.constant 0 : i32
    %c0_i32_0 = arith.constant 0 : i32
    return %arg0, %c0_i32, %arg1 : i32, i32, i32
  }
  func.func @transform_1(%arg0: i32, %arg1: i32) -> (i32, i32, i32) {
    %c0_i32 = arith.constant 0 : i32
    %c0_i32_0 = arith.constant 0 : i32
    return %arg0, %c0_i32, %arg1 : i32, i32, i32
  }
  func.func @transform_2(%arg0: i32, %arg1: i32) -> (i32, i32) {
    %c0_i32 = arith.constant 0 : i32
    %c0_i32_0 = arith.constant 0 : i32
    %c0_i32_1 = arith.constant 0 : i32
    return %c0_i32, %c0_i32_0 : i32, i32
  }
  func.func @transform_3(%arg0: i32, %arg1: i32) -> (i32, i32) {
    %c0_i32 = arith.constant 0 : i32
    %c0_i32_0 = arith.constant 0 : i32
    %c0_i32_1 = arith.constant 0 : i32
    return %c0_i32, %c0_i32_0 : i32, i32
  }
  func.func @transform_4(%arg0: i32, %arg1: i32) -> (i32, i32) {
    %c0_i32 = arith.constant 0 : i32
    %c0_i32_0 = arith.constant 0 : i32
    %c0_i32_1 = arith.constant 0 : i32
    return %c0_i32, %c0_i32_0 : i32, i32
  }
  func.func @transform_5(%arg0: i32, %arg1: i32) -> (i32, i32, i32) {
    %c0_i32 = arith.constant 0 : i32
    %c0_i32_0 = arith.constant 0 : i32
    return %arg0, %c0_i32, %arg1 : i32, i32, i32
  }
}

</mosaic_0001>

<bundles_post_ra>
// kernel: tpu_custom_call.1
= control target key start
LH: loop header
LB: loop body
LE: loop exit
PB: predicated region body
PF: predicated region fallthrough
CT: control target
= control target key end

     0   :  { %10 = vsyncpa [#allocation3], 0  ;;  %s737_s0 = inlined_call_operand.vmem [shape: f32[2,3,64], index: 0, kind: input, shape index: {}]   ;;  %s738_s1 = inlined_call_operand.vmem [shape: f32[2,1,64], index: 1, kind: input, shape index: {}]   ;;  %s739_s2 = inlined_call_operand.vmem [shape: f32[8,3], index: 2, kind: input, shape index: {}]   ;;  %s740_s3 = inlined_call_operand.vmem [shape: f32[8,1], index: 3, kind: input, shape index: {}]   ;;  %s741_s4 = inlined_call_operand.vmem [shape: f32[8,1], index: 4, kind: input, shape index: {}]   ;;  %s742_s5 = inlined_call_operand.hbm [shape: f32[2,8,64], index: 5, kind: output, shape index: {}]  }
   0x1   :  { %12 = vsyncpa [#allocation3 + $0x1], 0  ;;  %s613_s18 = smov 0   ;;  %s615_s19 = smov 0  }
   0x2   :  { %s617_s20 = smov 0   ;;  %s619_s21 = smov 0  }
   0x3   :  { %s621_s22 = smov 0   ;;  %s623_s23 = smov 0  }
   0x4 LB: > { %s424_s24 = sadd.s32 4294967295, %s577_s23   ;;  %s425_s25 = sadd.s32 4294967294, %s577_s23   ;;  %s577_s23 = sphi %s623_s23, %s18_s23   ;;  %s573_s22 = sphi %s621_s22, %s749_s22   ;;  %s569_s21 = sphi %s619_s21, %s748_s21   ;;  %s565_s20 = sphi %s617_s20, %s747_s20   ;;  %s561_s19 = sphi %s615_s19, %s746_s19   ;;  %s557_s18 = sphi %s613_s18, %s745_s18  }
   0x5   : > { %s30_s26 = sadd.s32 1, %s573_s22  ;;  %s158_s27 = sadd.s32 1, %s565_s20 }
   0x6   : > { %p32_p0 = scmp.ge.s32.totalorder %s30_s26, 2  ;;  %p168_p1 = scmp.ne.s32.totalorder %s565_s20, %s561_s19 }
   0x7   : > { %p169_p2 = scmp.eq.s32.totalorder %s424_s24, 1  ;;  %p174_p3 = scmp.ne.s32.totalorder %s561_s19, %s557_s18 }
   0x8   : > { %s751_s26 = smov (%p32_p0, %s30_s26), 0  ;;  %p175_p5 = scmp.eq.s32.totalorder %s425_s25, 1 }
   0x9   : > { %p653_p4 = por %p169_p2, %p168_p1  ;;  %s153_s29 = ssub.s32 %s573_s22, %s751_s26 }
   0xa   : > { %p428_p6 = scmp.ge.s32.totalorder %s577_s23, 1  ;;  %p156_p7 = scmp.eq.s32.totalorder %s153_s29, 0 }
   0xb   : > { %p660_p8 = por %p175_p5, %p174_p3  ;;  %p221_p9 = scmp.lt.s32.totalorder %s577_s23, 3 }
   0xc   : > { %s666_s6 = scalar_select %p156_p7, %s565_s20, %s158_s27  }
   0xd   : > { %p222_p10 = pnand %p428_p6, %p221_p9 }
   0xe   : > { %v272_v0 = vld [vmem:[%s739_s2] sm:$0xff] (!%p222_p10)  ;;  %v579_v1 = vmov (!%p222_p10), 2   ;;  %v580_v2 = vmov (!%p222_p10), 0   ;;  %v581_v4 = vmov (!%p222_p10), 1   ;;  %p257_p11 = scmp.lt.s32.totalorder (!%p222_p10), %s569_s21, 1  ;;  %v279_v6 = vlaneseq (!%p222_p10)  ;;  %s254_s29 = sand.u32 (!%p222_p10), 1, %s561_s19  }
   0xf   : > { %225 = sbr.rel (%p222_p10) target bundleno = 173 (0xad), region = 40  ;;  %496 = vset.pattern.permute.xlu1 (!%p222_p10), %v579_v1  ;;  %494 = vset.pattern.permute.xlu0 (!%p222_p10), %v580_v2  ;;  %v273_v3 = vld [vmem:[%s740_s3] sm:$0xff] (!%p222_p10)  ;;  %s429_s7 = sshll.u32 (!%p222_p10), %s254_s29, 3  ;;  %vm324_vm0 = vcmask (!%p222_p10), 523264  }
  0x10   : > { %295 = vperm.xlu1 (!%p222_p10), %496, %v272_v0   ;;  %276 = vperm.xlu0 (!%p222_p10), %494, %v272_v0   ;;  %v317_v5 = vld [vmem:[%s741_s4] sm:$0xff] (!%p222_p10)  ;;  %v280_v7 = vshrl.u32 (!%p222_p10), %v279_v6, 7  ;;  %s433_s8 = sshll.u32 (!%p222_p10), %s569_s21, 7  ;;  %s256_s9 = scalar_lea.vmem (!%p222_p10), [#allocation2], %s429_s7 }
  0x11   : > { %s341_s10 = sshll.u32 (!%p222_p10), %s256_s9, 4  ;;  %s692_s10 = int_to_ptr.vmem [resolvable:$true] %s341_s10 }
  0x12   : > { %v281_v8 = vsub.s32 (!%p222_p10), 0, %v280_v7  ;;  %v290_v9 = vsub.s32 (!%p222_p10), 1, %v280_v7  ;;  %v300_v12 = vsub.s32 (!%p222_p10), 2, %v280_v7  ;;  %s499_s15 = scalar_lea.vmem (!%p222_p10), %s692_s10, 128 }
  0x13   : > { %p500_p12 = scmp.ne.s32.totalorder (!%p222_p10), %s692_s10, %s499_s15 }
  0x14   : > { %497 = vset.pattern.permute.xlu1 (!%p222_p10), %v580_v2  ;;  %495 = vset.pattern.permute.xlu0 (!%p222_p10), %v581_v4 }
  0x15   : > { %306 = vperm.xlu1 (!%p222_p10), %497, %v273_v3   ;;  %285 = vperm.xlu0 (!%p222_p10), %495, %v272_v0   ;;  %p501_p13 = pnand (!%p222_p10), %p500_p12, %p653_p4 }
  0x16   : > { %s258_s13 = scalar_select %p257_p11, %s569_s21, 1 }
  0x17   : > { %p502_p0 = pneg %p501_p13  ;;  %s582_s21 = smov [#allocation2]  }
  0x18   : > { %s430_s14 = sshll.u32 %s258_s13, 2  ;;  %s269_s27 = scalar_lea.vmem %s738_s1, %s258_s13 }
  0x19   : > { %320 = vperm.xlu1 %497, %v317_v5   ;;  %498 = vset.pattern.permute.xlu0 %v580_v2  ;;  %s263_s17 = scalar_lea.vmem %s737_s0, %s430_s14  ;;  %v431_v17 = vld [vmem:[%s269_s27] ss:$0 sm:$0xff]  ;;  %s690_s13 = scalar_lea.hbm %s742_s5, %s433_s8 }
  0x1a   : > { %v270_v10 = vld [vmem:[%s263_s17] sm:$0x7]  ;;  %s327_s14 = scalar_lea.sflag [#allocation3], %s254_s29  ;;  %s503_s16 = sshll.u32 %s582_s21, 4  ;;  %s504_s16 = int_to_ptr.vmem [resolvable:$false] %s503_s16 }
  0x1b   : > { %v282_v14 = vrot.slane %v270_v10, %v281_v8  ;;  %v291_v15 = vrot.slane %v270_v10, %v290_v9  ;;  %v301_v16 = vrot.slane %v270_v10, %v300_v12  ;;  %s505_s17 = scalar_lea.vmem %s504_s16, 256  ;;  %p506_p1 = scmp.lt.s32.totalorder %s692_s10, %s504_s16 }
  0x1c   : > { %p507_p2 = scmp.lt.s32.totalorder %s505_s17, %s499_s15 }
  0x1e   : > { %p508_p3 = por %p507_p2, %p506_p1 }
  0x20   : > { %p509_p5 = pnand %p508_p3, %p502_p0 }
  0x8f   : > { %v277_v11 = vpop.permute.xlu0 %276  ;;  %v296_v13 = vpop.permute.xlu1 %295 }
  0x90   : > { %v283_v19 = vmul.f32 %v282_v14, %v277_v11  ;;  %v302_v22 = vmul.f32 %v301_v16, %v296_v13 }
  0x94   : > { %v286_v18 = vpop.permute.xlu0 %285  ;;  %v307_v21 = vpop.permute.xlu1 %306 }
  0x95   : > { %v292_v20 = vmul.f32 %v291_v15, %v286_v18  ;;  %v315_v23 = vmul.f32 %v431_v17, %v307_v21 }
  0x97   : > { %v293_v24 = vadd.f32 %v292_v20, %v283_v19 }
  0x98   : > { %v321_v27 = vpop.permute.xlu1 %320 }
  0x99   : > { %v303_v25 = vadd.f32 %v302_v22, %v293_v24 }
  0x9b   : > { %v316_v26 = vadd.f32 %v315_v23, %v303_v25 }
  0x9d   : > { %v323_v28 = vadd.f32 %v321_v27, %v316_v26 }
  0x9f   : > { %325 = vst.msk [vmem:[%s256_s9] sm:$0xff] %vm324_vm0, %v323_v28 }
  0xa0   : > { %512 = shalt.err (!%p509_p5)
}
  0xa1   : > { %s513_s24 = scalar_lea.hbm %s690_s13, 128  ;;  %s517_s29 = scalar_lea.hbm %s742_s5, 256 }
  0xa2   : > { %p514_p6 = scmp.ne.s32.totalorder %s690_s13, %s513_s24  ;;  %p518_p10 = scmp.lt.u32.totalorder %s690_s13, %s742_s5 }
  0xa3   : > { %p519_p11 = scmp.lt.u32.totalorder %s517_s29, %s513_s24  ;;  %p521_p13 = scmp.lt.u32.totalorder %s513_s24, %s690_s13 }
  0xa4   : > { %p515_p7 = pnand %p514_p6, %p653_p4 }
  0xa5   : > { %p520_p12 = por %p519_p11, %p518_p10 }
  0xa6   : > { %p516_p9 = pneg %p515_p7 }
  0xa7   : > { %p522_p0 = por %p521_p13, %p520_p12 }
  0xa9   : > { %p523_p1 = pnand %p522_p0, %p516_p9 }
  0xab   : > { %526 = shalt.err (!%p523_p1)
}
  0xac   : > { %436 = dma.vmem_to_hbm [thread:$0]  (%p653_p4), %s692_s10, 128, %s690_s13, %s327_s14  }
  0xad PF: > { %p442_p2 = scmp.ge.s32.totalorder %s577_s23, 2  ;;  %s353_s9 = sand.u32 1, %s557_s18  }
  0xae   : > { %s354_s11 = scalar_lea.sflag [#allocation3], %s353_s9 }
  0xaf   : > { %p439_p3 = pnand %p442_p2, %p660_p8 }
  0xb1   : > { %552 = dma.done.wait (!%p439_p3), %s354_s11, 128  }
  0xb2   : > { %554 = vsyncadd (!%p439_p3), %s354_s11, 4294967168  ;;  %s18_s23 = sadd.s32 1, %s577_s23   ;;  %s745_s18 = smov %s561_s19 }
  0xb3   : > { %p15_p5 = scmp.ge.s32.totalorder %s18_s23, 4   ;;  %s746_s19 = smov %s565_s20 }
  0xb4   : > { %s747_s20 = smov %s666_s6  ;;  %s748_s21 = smov %s573_s22 }
  0xb5   : > { %s749_s22 = smov %s751_s26  ;;  %17 = sbr.rel (!%p15_p5) target bundleno = 4 (0x4), region = 78 }
  0xbc   :  { %359 = vsyncpa [#allocation3], 1 }
  0xbd   :  { %361 = vsyncpa [#allocation3 + $0x1], 1 }

</bundles_post_ra>
